<compile_context>
chip_gen: v6e
topology: v6e:2x2x1
jax: 0.10.0
libtpu: 0.0.40
codegen_flags: <defaults>
</compile_context>

<pallas_src>
import jax
import jax.numpy as jnp
from jax.experimental import pallas as pl
from jax.experimental.pallas import tpu as pltpu


def _dot_zt_w(z, w):
    # z: (M, K), w: (N, K) -> (M, N); contract the K (last) dims directly so no
    # transposed weight copy is ever created.  Default matmul precision is kept
    # (fast MXU path); set precision=jax.lax.Precision.HIGHEST here if strict
    # f32 parity with the torch Linear matters beyond ~1e-4.
    return jax.lax.dot_general(
        z, w,
        dimension_numbers=(((1,), (1,)), ((), ())),
        preferred_element_type=jnp.float32)


# ----------------------- single-step kernels (module.forward) ----------------

def lif_first_step_kernel(z_ref, w_ref, v_ref):
    # state=None  =>  v_prev == 0, so the decay term vanishes entirely.
    i = _dot_zt_w(z_ref[...], w_ref[...])
    v_ref[...] = (i * 1.3 - 0.8).astype(v_ref.dtype)


def lif_step_kernel(z_ref, w_ref, decay_ref, vprev_ref, v_ref):
    i = _dot_zt_w(z_ref[...], w_ref[...])
    v = (vprev_ref[...] * decay_ref[...] + i) * 1.3 - 0.8
    v_ref[...] = v.astype(v_ref.dtype)


def non_spiking_mlp_step(z, w, v_decay, v_prev=None):
    """One forward() call of non_SpikingMLP.

    z: (B, K) f32, w: (N, K) f32 (torch Linear layout), v_decay: (N,) f32,
    v_prev: (B, N) f32 or None (state=None on the first call).
    Returns v: (B, N) f32 (which is also the new carried state).
    """
    B, K = z.shape
    N = w.shape[0]

    if v_prev is None:
        # First call: skip the v_prev stream entirely.
        return pl.pallas_call(
            lif_first_step_kernel,
            out_shape=jax.ShapeDtypeStruct((B, N), jnp.float32),
            grid=(1,),
            in_specs=[pl.BlockSpec((B, K), lambda i: (0, 0)),
                      pl.BlockSpec((N, K), lambda i: (0, 0))],
            out_specs=pl.BlockSpec((B, N), lambda i: (0, 0)),
            compiler_params=pltpu.CompilerParams(
                dimension_semantics=("arbitrary",)),
        )(z, w)

    decay = v_decay.reshape(1, N)
    return pl.pallas_call(
        lif_step_kernel,
        out_shape=jax.ShapeDtypeStruct((B, N), jnp.float32),
        grid=(1,),
        in_specs=[pl.BlockSpec((B, K), lambda i: (0, 0)),
                  pl.BlockSpec((N, K), lambda i: (0, 0)),
                  pl.BlockSpec((1, N), lambda i: (0, 0)),
                  pl.BlockSpec((B, N), lambda i: (0, 0))],
        out_specs=pl.BlockSpec((B, N), lambda i: (0, 0)),
        input_output_aliases={3: 0},      # v_prev buffer updated in place
        compiler_params=pltpu.CompilerParams(
            dimension_semantics=("arbitrary",)),
    )(z, w, decay, v_prev)


# ------------------- fused multi-timestep kernel (T forward calls) -----------

def non_spiking_mlp_forward_fused(zs, w, v_decay):
    """Equivalent to T successive forward() calls starting from state=None.

    zs: (T, B, K) f32.  Returns vs: (T, B, N) f32 where vs[t] is the module
    output of call t; vs[-1] is the carried state after the last call.
    """
    T, B, K = zs.shape
    N = w.shape[0]

    def fused_kernel(zflat_ref, w_ref, decay_ref, vs_ref):
        # One big MXU matmul for every timestep at once: (T*B, K) x (N, K)^T.
        # Constant folding:  v_t = v_{t-1} * (1.3*decay) + (1.3*i_t - 0.8)
        vs_ref[...] = _dot_zt_w(zflat_ref[...], w_ref[...]) * 1.3 - 0.8
        # Hoist the (1, N) -> (B, N) broadcast out of the recurrence loop.
        decay13 = jnp.broadcast_to(decay_ref[...] * 1.3, (B, N))
        # Tiny VPU-only recurrence; T is small and static -> fully unrolled,
        # all slice boundaries are static and sublane-aligned (B multiple of 8).
        v = jnp.zeros((B, N), jnp.float32)
        for t in range(T):
            v = v * decay13 + vs_ref[t * B:(t + 1) * B, :]
            vs_ref[t * B:(t + 1) * B, :] = v

    vs_flat = pl.pallas_call(
        fused_kernel,
        out_shape=jax.ShapeDtypeStruct((T * B, N), jnp.float32),
        grid=(1,),
        in_specs=[pl.BlockSpec((T * B, K), lambda i: (0, 0)),
                  pl.BlockSpec((N, K), lambda i: (0, 0)),
                  pl.BlockSpec((1, N), lambda i: (0, 0))],
        out_specs=pl.BlockSpec((T * B, N), lambda i: (0, 0)),
        compiler_params=pltpu.CompilerParams(
            dimension_semantics=("arbitrary",)),
    )(zs.reshape(T * B, K), w, v_decay.reshape(1, N))
    return vs_flat.reshape(T, B, N)


if __name__ == "__main__":
    B, K, N = 8, 128, 128      # batch, l_1_size, output_size
    T = 8                      # number of forward() calls (timesteps)

    key = jax.random.PRNGKey(0)
    k_z, k_w, k_d = jax.random.split(key, 3)

    # Deterministic synthetic parameters (matching torch init distributions):
    #   nn.Linear(K, N, bias=False): W ~ U(-1/sqrt(K), 1/sqrt(K)), shape (N, K)
    #   LIF_no_thres.v_decay       : ~ U(0.3, 0.4), shape (N,)
    bound = 1.0 / jnp.sqrt(jnp.float32(K))
    w = jax.random.uniform(k_w, (N, K), jnp.float32, minval=-bound, maxval=bound)
    v_decay = jax.random.uniform(k_d, (N,), jnp.float32, minval=0.3, maxval=0.4)
    zs = jax.random.normal(k_z, (T, B, K), jnp.float32)

    # Pure-JAX reference: T sequential forward() calls of the torch module.
    def ref_forward(zs, w, v_decay):
        def step(v, z_t):
            v = -0.8 + (v * v_decay[None, :] + z_t @ w.T) * 1.3
            return v, v
        v0 = jnp.zeros((zs.shape[1], w.shape[0]), jnp.float32)
        _, vs = jax.lax.scan(step, v0, zs)
        return vs

    vs_ref = jax.block_until_ready(ref_forward(zs, w, v_decay))

    # 1) Fused kernel: all T timesteps in a single pallas_call.
    vs_fused = jax.block_until_ready(non_spiking_mlp_forward_fused(zs, w, v_decay))
    assert jnp.allclose(vs_fused, vs_ref, atol=1e-4, rtol=1e-4)

    # 2) Step-wise path (same call pattern as the torch module: first call with
    #    state=None, then carrying the state, updated in place via aliasing).
    v = non_spiking_mlp_step(zs[0], w, v_decay)           # state=None
    for t in range(1, T):
        v = non_spiking_mlp_step(zs[t], w, v_decay, v)    # aliased in-place state
    v = jax.block_until_ready(v)
    assert jnp.allclose(v, vs_ref[-1], atol=1e-4, rtol=1e-4)

    print("KERNEL_OK")
</pallas_src>

<mosaic_0001>
module attributes {stable_mosaic.version = 11 : i64} {
  func.func @fused_kernel(%arg0: i32, %arg1: memref<64x128xf32, #tpu.memory_space<vmem>>, %arg2: memref<128x128xf32, #tpu.memory_space<vmem>>, %arg3: memref<1x128xf32, #tpu.memory_space<vmem>>, %arg4: memref<64x128xf32, #tpu.memory_space<vmem>>) attributes {dimension_semantics = [#tpu.dimension_semantics<arbitrary>], iteration_bounds = array<i64: 1>, scalar_prefetch = 0 : i64, scratch_operands = 0 : i64, tpu.core_type = #tpu.core_type<tc>, window_params = [{pipeline_mode = #tpu.pipeline_mode<synchronous>, transform_indices = @transform_0, window_bounds = array<i64: 64, 128>}, {pipeline_mode = #tpu.pipeline_mode<synchronous>, transform_indices = @transform_1, window_bounds = array<i64: 128, 128>}, {pipeline_mode = #tpu.pipeline_mode<synchronous>, transform_indices = @transform_2, window_bounds = array<i64: 1, 128>}, {pipeline_mode = #tpu.pipeline_mode<synchronous>, transform_indices = @transform_3, window_bounds = array<i64: 64, 128>}]} {
    %c0 = arith.constant 0 : index
    %c0_0 = arith.constant 0 : index
    %0 = vector.load %arg1[%c0, %c0_0] : memref<64x128xf32, #tpu.memory_space<vmem>>, vector<64x128xf32>
    %c0_1 = arith.constant 0 : index
    %c0_2 = arith.constant 0 : index
    %1 = vector.load %arg2[%c0_1, %c0_2] : memref<128x128xf32, #tpu.memory_space<vmem>>, vector<128x128xf32>
    %cst = arith.constant dense<0.000000e+00> : vector<64x128xf32>
    %2 = tpu.matmul %0, %1, %cst {dimension_numbers = #tpu.dot_dimension_numbers<[1], [1], [0], [0], [0, 0, 1, 0], [], []>} : vector<64x128xf32>, vector<128x128xf32>, vector<64x128xf32> -> vector<64x128xf32>
    %cst_3 = arith.constant 1.300000e+00 : f32
    %3 = vector.broadcast %cst_3 : f32 to vector<64x128xf32>
    %4 = arith.mulf %2, %3 : vector<64x128xf32>
    %cst_4 = arith.constant 8.000000e-01 : f32
    %5 = vector.broadcast %cst_4 : f32 to vector<64x128xf32>
    %6 = arith.subf %4, %5 : vector<64x128xf32>
    %c0_5 = arith.constant 0 : index
    %c0_6 = arith.constant 0 : index
    %7 = vector.load %arg4[%c0_5, %c0_6] : memref<64x128xf32, #tpu.memory_space<vmem>>, vector<64x128xf32>
    tpu.vector_store %arg4[%c0_5, %c0_6], %6 {strides = array<i32>} : memref<64x128xf32, #tpu.memory_space<vmem>>, vector<64x128xf32>,
    %c0_7 = arith.constant 0 : index
    %c0_8 = arith.constant 0 : index
    %8 = vector.load %arg3[%c0_7, %c0_8] : memref<1x128xf32, #tpu.memory_space<vmem>>, vector<1x128xf32>
    %cst_9 = arith.constant 1.300000e+00 : f32
    %9 = vector.broadcast %cst_9 : f32 to vector<1x128xf32>
    %10 = arith.mulf %8, %9 : vector<1x128xf32>
    %11 = vector.shape_cast %10 : vector<1x128xf32> to vector<1x128xf32>
    %12 = vector.broadcast %11 : vector<1x128xf32> to vector<8x128xf32>
    %cst_10 = arith.constant 0.000000e+00 : f32
    %13 = vector.broadcast %cst_10 : f32 to vector<8x128xf32>
    %14 = arith.mulf %13, %12 : vector<8x128xf32>
    %c0_11 = arith.constant 0 : index
    %c0_12 = arith.constant 0 : index
    %15 = vector.load %arg4[%c0_11, %c0_12] : memref<64x128xf32, #tpu.memory_space<vmem>>, vector<8x128xf32>
    %16 = arith.addf %14, %15 : vector<8x128xf32>
    %c0_13 = arith.constant 0 : index
    %c0_14 = arith.constant 0 : index
    %17 = vector.load %arg4[%c0_13, %c0_14] : memref<64x128xf32, #tpu.memory_space<vmem>>, vector<8x128xf32>
    tpu.vector_store %arg4[%c0_13, %c0_14], %16 {strides = array<i32>} : memref<64x128xf32, #tpu.memory_space<vmem>>, vector<8x128xf32>,
    %18 = arith.mulf %16, %12 : vector<8x128xf32>
    %c8 = arith.constant 8 : index
    %c0_15 = arith.constant 0 : index
    %19 = vector.load %arg4[%c8, %c0_15] : memref<64x128xf32, #tpu.memory_space<vmem>>, vector<8x128xf32>
    %20 = arith.addf %18, %19 : vector<8x128xf32>
    %c8_16 = arith.constant 8 : index
    %c0_17 = arith.constant 0 : index
    %21 = vector.load %arg4[%c8_16, %c0_17] : memref<64x128xf32, #tpu.memory_space<vmem>>, vector<8x128xf32>
    tpu.vector_store %arg4[%c8_16, %c0_17], %20 {strides = array<i32>} : memref<64x128xf32, #tpu.memory_space<vmem>>, vector<8x128xf32>,
    %22 = arith.mulf %20, %12 : vector<8x128xf32>
    %c16 = arith.constant 16 : index
    %c0_18 = arith.constant 0 : index
    %23 = vector.load %arg4[%c16, %c0_18] : memref<64x128xf32, #tpu.memory_space<vmem>>, vector<8x128xf32>
    %24 = arith.addf %22, %23 : vector<8x128xf32>
    %c16_19 = arith.constant 16 : index
    %c0_20 = arith.constant 0 : index
    %25 = vector.load %arg4[%c16_19, %c0_20] : memref<64x128xf32, #tpu.memory_space<vmem>>, vector<8x128xf32>
    tpu.vector_store %arg4[%c16_19, %c0_20], %24 {strides = array<i32>} : memref<64x128xf32, #tpu.memory_space<vmem>>, vector<8x128xf32>,
    %26 = arith.mulf %24, %12 : vector<8x128xf32>
    %c24 = arith.constant 24 : index
    %c0_21 = arith.constant 0 : index
    %27 = vector.load %arg4[%c24, %c0_21] : memref<64x128xf32, #tpu.memory_space<vmem>>, vector<8x128xf32>
    %28 = arith.addf %26, %27 : vector<8x128xf32>
    %c24_22 = arith.constant 24 : index
    %c0_23 = arith.constant 0 : index
    %29 = vector.load %arg4[%c24_22, %c0_23] : memref<64x128xf32, #tpu.memory_space<vmem>>, vector<8x128xf32>
    tpu.vector_store %arg4[%c24_22, %c0_23], %28 {strides = array<i32>} : memref<64x128xf32, #tpu.memory_space<vmem>>, vector<8x128xf32>,
    %30 = arith.mulf %28, %12 : vector<8x128xf32>
    %c32 = arith.constant 32 : index
    %c0_24 = arith.constant 0 : index
    %31 = vector.load %arg4[%c32, %c0_24] : memref<64x128xf32, #tpu.memory_space<vmem>>, vector<8x128xf32>
    %32 = arith.addf %30, %31 : vector<8x128xf32>
    %c32_25 = arith.constant 32 : index
    %c0_26 = arith.constant 0 : index
    %33 = vector.load %arg4[%c32_25, %c0_26] : memref<64x128xf32, #tpu.memory_space<vmem>>, vector<8x128xf32>
    tpu.vector_store %arg4[%c32_25, %c0_26], %32 {strides = array<i32>} : memref<64x128xf32, #tpu.memory_space<vmem>>, vector<8x128xf32>,
    %34 = arith.mulf %32, %12 : vector<8x128xf32>
    %c40 = arith.constant 40 : index
    %c0_27 = arith.constant 0 : index
    %35 = vector.load %arg4[%c40, %c0_27] : memref<64x128xf32, #tpu.memory_space<vmem>>, vector<8x128xf32>
    %36 = arith.addf %34, %35 : vector<8x128xf32>
    %c40_28 = arith.constant 40 : index
    %c0_29 = arith.constant 0 : index
    %37 = vector.load %arg4[%c40_28, %c0_29] : memref<64x128xf32, #tpu.memory_space<vmem>>, vector<8x128xf32>
    tpu.vector_store %arg4[%c40_28, %c0_29], %36 {strides = array<i32>} : memref<64x128xf32, #tpu.memory_space<vmem>>, vector<8x128xf32>,
    %38 = arith.mulf %36, %12 : vector<8x128xf32>
    %c48 = arith.constant 48 : index
    %c0_30 = arith.constant 0 : index
    %39 = vector.load %arg4[%c48, %c0_30] : memref<64x128xf32, #tpu.memory_space<vmem>>, vector<8x128xf32>
    %40 = arith.addf %38, %39 : vector<8x128xf32>
    %c48_31 = arith.constant 48 : index
    %c0_32 = arith.constant 0 : index
    %41 = vector.load %arg4[%c48_31, %c0_32] : memref<64x128xf32, #tpu.memory_space<vmem>>, vector<8x128xf32>
    tpu.vector_store %arg4[%c48_31, %c0_32], %40 {strides = array<i32>} : memref<64x128xf32, #tpu.memory_space<vmem>>, vector<8x128xf32>,
    %42 = arith.mulf %40, %12 : vector<8x128xf32>
    %c56 = arith.constant 56 : index
    %c0_33 = arith.constant 0 : index
    %43 = vector.load %arg4[%c56, %c0_33] : memref<64x128xf32, #tpu.memory_space<vmem>>, vector<8x128xf32>
    %44 = arith.addf %42, %43 : vector<8x128xf32>
    %c56_34 = arith.constant 56 : index
    %c0_35 = arith.constant 0 : index
    %45 = vector.load %arg4[%c56_34, %c0_35] : memref<64x128xf32, #tpu.memory_space<vmem>>, vector<8x128xf32>
    tpu.vector_store %arg4[%c56_34, %c0_35], %44 {strides = array<i32>} : memref<64x128xf32, #tpu.memory_space<vmem>>, vector<8x128xf32>,
    return
  }
  func.func @transform_0(%arg0: i32) -> (i32, i32) {
    %c0_i32 = arith.constant 0 : i32
    %c0_i32_0 = arith.constant 0 : i32
    %c0_i32_1 = arith.constant 0 : i32
    return %c0_i32, %c0_i32_0 : i32, i32
  }
  func.func @transform_1(%arg0: i32) -> (i32, i32) {
    %c0_i32 = arith.constant 0 : i32
    %c0_i32_0 = arith.constant 0 : i32
    %c0_i32_1 = arith.constant 0 : i32
    return %c0_i32, %c0_i32_0 : i32, i32
  }
  func.func @transform_2(%arg0: i32) -> (i32, i32) {
    %c0_i32 = arith.constant 0 : i32
    %c0_i32_0 = arith.constant 0 : i32
    %c0_i32_1 = arith.constant 0 : i32
    return %c0_i32, %c0_i32_0 : i32, i32
  }
  func.func @transform_3(%arg0: i32) -> (i32, i32) {
    %c0_i32 = arith.constant 0 : i32
    %c0_i32_0 = arith.constant 0 : i32
    %c0_i32_1 = arith.constant 0 : i32
    return %c0_i32, %c0_i32_0 : i32, i32
  }
}

</mosaic_0001>

<bundles_post_ra>
// kernel: tpu_custom_call.1
= control target key start
LH: loop header
LB: loop body
LE: loop exit
PB: predicated region body
PF: predicated region fallthrough
CT: control target
= control target key end

     0   :  { %8 = vsyncpa [#allocation3], 0  ;;  %s479_s0 = inlined_call_operand.hbm [shape: f32[64,128], index: 0, kind: input, shape index: {}]   ;;  %s480_s1 = inlined_call_operand.hbm [shape: f32[128,128], index: 1, kind: input, shape index: {}]   ;;  %s481_s2 = inlined_call_operand.vmem [shape: f32[1,128], index: 2, kind: input, shape index: {}]   ;;  %s482_s3 = inlined_call_operand.hbm [shape: f32[64,128], index: 3, kind: output, shape index: {}]  }
   0x1   :  { %9 = vsyncpa [#allocation6], 0 }
   0x2   :  { %10 = vsyncpa [#allocation4], 0  ;;  %s433_s12 = smov [#allocation2]  }
   0x3   :  { %s16_s13 = sshll.u32 %s433_s12, 4  ;;  %s17_s13 = int_to_ptr.vmem [resolvable:$true] %s16_s13 }
   0x4   :  { %s375_s14 = scalar_lea.vmem %s17_s13, 1024  ;;  %p380_p1 = scmp.lt.s32.totalorder %s17_s13, %s17_s13 }
   0x5   :  { %p376_p0 = scmp.ne.s32.totalorder %s17_s13, %s375_s14  ;;  %p381_p2 = scmp.lt.s32.totalorder %s375_s14, %s375_s14 }
   0x7   :  { %p382_p3 = por %p381_p2, %p380_p1 }
   0x9   :  { %p383_p4 = pnand %p382_p3, %p376_p0 }
   0xb   :  { %386 = shalt.err (!%p383_p4)
}
   0xc   :  { %s434_s15 = smov 128   ;;  %s435_s16 = smov 8  }
   0xd   :  { %22 = dma.hbm_to_vmem [thread:$0]  %s479_s0, 1024, %s17_s13, [#allocation3], %s434_s15, %s434_s15, %s435_s16  }
   0xe   :  { %s436_s19 = smov [#allocation5]  }
   0xf   :  { %s28_s20 = sshll.u32 %s436_s19, 4  ;;  %s29_s20 = int_to_ptr.vmem [resolvable:$true] %s28_s20 }
  0x10   :  { %s395_s21 = scalar_lea.vmem %s29_s20, 2048  ;;  %p400_p6 = scmp.lt.s32.totalorder %s29_s20, %s29_s20 }
  0x11   :  { %p396_p5 = scmp.ne.s32.totalorder %s29_s20, %s395_s21  ;;  %p401_p7 = scmp.lt.s32.totalorder %s395_s21, %s395_s21 }
  0x13   :  { %p402_p8 = por %p401_p7, %p400_p6 }
  0x15   :  { %p403_p9 = pnand %p402_p8, %p396_p5 }
  0x17   :  { %406 = shalt.err (!%p403_p9)
}
  0x18   :  { %34 = dma.hbm_to_vmem [thread:$0]  %s480_s1, 2048, %s29_s20, [#allocation6], %s434_s15, %s434_s15, %s435_s16  }
  0x19   :  { %427 = dma.done.wait [#allocation3], 1024  }
  0x1a   :  { %428 = vsyncadd [#allocation3], 4294966272 }
  0x1b   :  { %429 = dma.done.wait [#allocation6], 2048  }
  0x1c   :  { %430 = vsyncadd [#allocation6], 4294965248  ;;  %v66_v0 = vld [vmem:[#allocation5 + $0x78] sm:$0xff]  ;;  %v65_v1 = vld [vmem:[#allocation5 + $0x70] sm:$0xff]  ;;  %v199_v24 = vlaneseq }
  0x1d   :  { %286 = vmatprep.subr.mxu0 %v66_v0  ;;  %330 = vmatprep.subr.mxu1 %v66_v0  ;;  %v64_v2 = vld [vmem:[#allocation5 + $0x68] sm:$0xff]  ;;  %v43_v3 = vld [vmem:[#allocation2] sm:$0xff]  ;;  %v62_v6 = vld [vmem:[#allocation5 + $0x58] sm:$0xff] }
  0x1e   :  { %287 = vmatpush3.xpose.msra.mxu0 %v66_v0  ;;  %346 = vmatpush3.xpose.msra.mxu1 %v66_v0  ;;  %v47_v4 = vld [vmem:[#allocation2 + $0x20] sm:$0xff]  ;;  %v61_v7 = vld [vmem:[#allocation5 + $0x50] sm:$0xff]  ;;  %v60_v8 = vld [vmem:[#allocation5 + $0x48] sm:$0xff]  ;;  %v200_v25 = vshrl.u32 %v199_v24, 7 }
  0x1f   :  { %288 = vmatprep.subr.mxu0 %v65_v1  ;;  %331 = vmatprep.subr.mxu1 %v65_v1  ;;  %v63_v5 = vld [vmem:[#allocation5 + $0x60] sm:$0xff]  ;;  %v58_v10 = vld [vmem:[#allocation5 + $0x38] sm:$0xff]  ;;  %v57_v11 = vld [vmem:[#allocation5 + $0x30] sm:$0xff] }
  0x20   :  { %318 = vmatprep.mubr.f32.mxu0 %v43_v3  ;;  %324 = vmatprep.mubr.f32.mxu1 %v47_v4  ;;  %v59_v9 = vld [vmem:[#allocation5 + $0x40] sm:$0xff]  ;;  %v56_v12 = vld [vmem:[#allocation5 + $0x28] sm:$0xff]  ;;  %v54_v14 = vld [vmem:[#allocation5 + $0x18] sm:$0xff]  ;;  %v201_v28 = vsub.s32 0, %v200_v25 }
  0x21   :  { %v55_v13 = vld [vmem:[#allocation5 + $0x20] sm:$0xff]  ;;  %v53_v15 = vld [vmem:[#allocation5 + $0x10] sm:$0xff]  ;;  %v52_v16 = vld [vmem:[#allocation5 + $0x8] sm:$0xff] }
  0x22   :  { %289 = vmatpush3.xpose.msra.mxu0 %v65_v1  ;;  %347 = vmatpush3.xpose.msra.mxu1 %v65_v1  ;;  %v51_v17 = vld [vmem:[#allocation5] sm:$0xff]  ;;  %v44_v18 = vld [vmem:[#allocation2 + $0x8] sm:$0xff]  ;;  %v45_v20 = vld [vmem:[#allocation2 + $0x10] sm:$0xff] }
  0x23   :  { %290 = vmatprep.subr.mxu0 %v64_v2  ;;  %332 = vmatprep.subr.mxu1 %v64_v2  ;;  %v48_v19 = vld [vmem:[#allocation2 + $0x28] sm:$0xff]  ;;  %v49_v21 = vld [vmem:[#allocation2 + $0x30] sm:$0xff]  ;;  %v46_v22 = vld [vmem:[#allocation2 + $0x18] sm:$0xff] }
  0x24   :  { %v50_v23 = vld [vmem:[#allocation2 + $0x38] sm:$0xff]  ;;  %v196_v26 = vld [vmem:[%s481_s2] sm:$0x1]  ;;  %s437_s2 = smov [#allocation7]  }
  0x25   :  { %v197_v27 = vmul.f32 1.3, %v196_v26  ;;  %s241_s24 = sshll.u32 %s437_s2, 4  ;;  %s242_s24 = int_to_ptr.vmem [resolvable:$true] %s241_s24 }
  0x26   :  { %291 = vmatpush3.xpose.msra.mxu0 %v64_v2  ;;  %348 = vmatpush3.xpose.msra.mxu1 %v64_v2  ;;  %s407_s25 = scalar_lea.vmem %s242_s24, 1024  ;;  %p412_p11 = scmp.lt.s32.totalorder %s242_s24, %s242_s24 }
  0x27   :  { %292 = vmatprep.subr.mxu0 %v63_v5  ;;  %333 = vmatprep.subr.mxu1 %v63_v5  ;;  %v202_v29 = vrot.slane %v197_v27, %v201_v28  ;;  %p408_p10 = scmp.ne.s32.totalorder %s242_s24, %s407_s25  ;;  %p413_p12 = scmp.lt.s32.totalorder %s407_s25, %s407_s25 }
  0x29   :  { %v204_v33 = vmul.f32 0.0, %v202_v29  ;;  %p414_p13 = por %p413_p12, %p412_p11 }
  0x2a   :  { %293 = vmatpush3.xpose.msra.mxu0 %v63_v5  ;;  %349 = vmatpush3.xpose.msra.mxu1 %v63_v5 }
  0x2b   :  { %294 = vmatprep.subr.mxu0 %v62_v6  ;;  %334 = vmatprep.subr.mxu1 %v62_v6  ;;  %p415_p0 = pnand %p414_p13, %p408_p10 }
  0x2e   :  { %295 = vmatpush3.xpose.msra.mxu0 %v62_v6  ;;  %350 = vmatpush3.xpose.msra.mxu1 %v62_v6 }
  0x2f   :  { %296 = vmatprep.subr.mxu0 %v61_v7  ;;  %335 = vmatprep.subr.mxu1 %v61_v7 }
  0x32   :  { %297 = vmatpush3.xpose.msra.mxu0 %v61_v7  ;;  %351 = vmatpush3.xpose.msra.mxu1 %v61_v7 }
  0x33   :  { %298 = vmatprep.subr.mxu0 %v60_v8  ;;  %336 = vmatprep.subr.mxu1 %v60_v8 }
  0x36   :  { %299 = vmatpush3.xpose.msra.mxu0 %v60_v8  ;;  %352 = vmatpush3.xpose.msra.mxu1 %v60_v8 }
  0x37   :  { %300 = vmatprep.subr.mxu0 %v59_v9  ;;  %337 = vmatprep.subr.mxu1 %v59_v9 }
  0x3a   :  { %301 = vmatpush3.xpose.msra.mxu0 %v59_v9  ;;  %353 = vmatpush3.xpose.msra.mxu1 %v59_v9 }
  0x3b   :  { %302 = vmatprep.subr.mxu0 %v58_v10  ;;  %338 = vmatprep.subr.mxu1 %v58_v10 }
  0x3e   :  { %303 = vmatpush3.xpose.msra.mxu0 %v58_v10  ;;  %354 = vmatpush3.xpose.msra.mxu1 %v58_v10 }
  0x3f   :  { %304 = vmatprep.subr.mxu0 %v57_v11  ;;  %339 = vmatprep.subr.mxu1 %v57_v11 }
  0x42   :  { %305 = vmatpush3.xpose.msra.mxu0 %v57_v11  ;;  %355 = vmatpush3.xpose.msra.mxu1 %v57_v11 }
  0x43   :  { %306 = vmatprep.subr.mxu0 %v56_v12  ;;  %340 = vmatprep.subr.mxu1 %v56_v12 }
  0x46   :  { %307 = vmatpush3.xpose.msra.mxu0 %v56_v12  ;;  %356 = vmatpush3.xpose.msra.mxu1 %v56_v12 }
  0x47   :  { %308 = vmatprep.subr.mxu0 %v55_v13  ;;  %341 = vmatprep.subr.mxu1 %v55_v13 }
  0x4a   :  { %309 = vmatpush3.xpose.msra.mxu0 %v55_v13  ;;  %357 = vmatpush3.xpose.msra.mxu1 %v55_v13 }
  0x4b   :  { %310 = vmatprep.subr.mxu0 %v54_v14  ;;  %342 = vmatprep.subr.mxu1 %v54_v14 }
  0x4e   :  { %311 = vmatpush3.xpose.msra.mxu0 %v54_v14  ;;  %358 = vmatpush3.xpose.msra.mxu1 %v54_v14 }
  0x4f   :  { %312 = vmatprep.subr.mxu0 %v53_v15  ;;  %343 = vmatprep.subr.mxu1 %v53_v15 }
  0x52   :  { %313 = vmatpush3.xpose.msra.mxu0 %v53_v15  ;;  %359 = vmatpush3.xpose.msra.mxu1 %v53_v15 }
  0x53   :  { %314 = vmatprep.subr.mxu0 %v52_v16  ;;  %344 = vmatprep.subr.mxu1 %v52_v16 }
  0x56   :  { %315 = vmatpush3.xpose.msra.mxu0 %v52_v16  ;;  %360 = vmatpush3.xpose.msra.mxu1 %v52_v16 }
  0x57   :  { %316 = vmatprep.subr.mxu0 %v51_v17  ;;  %345 = vmatprep.subr.mxu1 %v51_v17 }
  0x5a   :  { %317 = vmatpush3.xpose.msra.mxu0 %v51_v17  ;;  %361 = vmatpush3.xpose.msra.mxu1 %v51_v17 }
  0x5d   :  { %319 = vmatmul.mubr.f32.vlgmr.msra.gmra.mxu0 %v44_v18  ;;  %325 = vmatmul.mubr.f32.vlgmr.msra.gmra.mxu1 %v48_v19 }
  0x5e   :  { %321 = vmatprep.mubr.f32.mxu0 %v45_v20  ;;  %327 = vmatprep.mubr.f32.mxu1 %v49_v21 }
  0x61   :  { %322 = vmatmul.mubr.f32.gmra.mxu0 %v46_v22  ;;  %328 = vmatmul.mubr.f32.gmra.mxu1 %v50_v23 }
 0x11d   :  { %v320_v30 = vpop.f32.mrf.mxu0  ;;  %v326_v42 = vpop.f32.mrf.mxu1 }
 0x11e   :  { %v173_v35 = vmul.f32 1.3, %v320_v30  ;;  %v177_v54 = vmul.f32 1.3, %v326_v42 }
 0x11f   :  { %v133_v31 = vpop.f32.mrf.mxu0  ;;  %v153_v47 = vpop.f32.mrf.mxu1 }
 0x120   :  { %v172_v32 = vmul.f32 1.3, %v133_v31  ;;  %v255_v39 = vadd.f32 -0.8, %v173_v35  ;;  %v176_v51 = vmul.f32 1.3, %v153_v47 }
 0x121   :  { %v323_v34 = vpop.f32.mrf.mxu0  ;;  %v329_v52 = vpop.f32.mrf.mxu1  ;;  %v259_v59 = vadd.f32 -0.8, %v177_v54 }
 0x122   :  { %v254_v36 = vadd.f32 -0.8, %v172_v32  ;;  %v175_v44 = vmul.f32 1.3, %v323_v34  ;;  %v258_v55 = vadd.f32 -0.8, %v176_v51 }
 0x123   :  { %v143_v37 = vpop.f32.mrf.mxu0  ;;  %v163_v57 = vpop.f32.mrf.mxu1  ;;  %v179_v63 = vmul.f32 1.3, %v329_v52 }
 0x124   :  { %v206_v38 = vadd.f32 %v254_v36, %v204_v33  ;;  %v174_v41 = vmul.f32 1.3, %v143_v37  ;;  %v257_v49 = vadd.f32 -0.8, %v175_v44  ;;  %v178_v61 = vmul.f32 1.3, %v163_v57 }
 0x125   :  { %v261_v3 = vadd.f32 -0.8, %v179_v63 }
 0x126   :  { %207 = vst [vmem:[#allocation7] sm:$0xff] %v206_v38  ;;  %v208_v40 = vmul.f32 %v206_v38, %v202_v29  ;;  %v256_v45 = vadd.f32 -0.8, %v174_v41  ;;  %v260_v0 = vadd.f32 -0.8, %v178_v61 }
 0x128   :  { %v210_v43 = vadd.f32 %v255_v39, %v208_v40 }
 0x12a   :  { %211 = vst [vmem:[#allocation7 + $0x8] sm:$0xff] %v210_v43  ;;  %v212_v46 = vmul.f32 %v210_v43, %v202_v29 }
 0x12c   :  { %v214_v48 = vadd.f32 %v256_v45, %v212_v46 }
 0x12e   :  { %215 = vst [vmem:[#allocation7 + $0x10] sm:$0xff] %v214_v48  ;;  %v216_v50 = vmul.f32 %v214_v48, %v202_v29 }
 0x130   :  { %v218_v53 = vadd.f32 %v257_v49, %v216_v50 }
 0x132   :  { %219 = vst [vmem:[#allocation7 + $0x18] sm:$0xff] %v218_v53  ;;  %v220_v56 = vmul.f32 %v218_v53, %v202_v29 }
 0x134   :  { %v222_v58 = vadd.f32 %v258_v55, %v220_v56 }
 0x136   :  { %223 = vst [vmem:[#allocation7 + $0x20] sm:$0xff] %v222_v58  ;;  %v224_v60 = vmul.f32 %v222_v58, %v202_v29 }
 0x138   :  { %v226_v62 = vadd.f32 %v259_v59, %v224_v60 }
 0x13a   :  { %227 = vst [vmem:[#allocation7 + $0x28] sm:$0xff] %v226_v62  ;;  %v228_v1 = vmul.f32 %v226_v62, %v202_v29 }
 0x13c   :  { %v230_v2 = vadd.f32 %v260_v0, %v228_v1 }
 0x13e   :  { %231 = vst [vmem:[#allocation7 + $0x30] sm:$0xff] %v230_v2  ;;  %v232_v4 = vmul.f32 %v230_v2, %v202_v29 }
 0x140   :  { %v234_v5 = vadd.f32 %v261_v3, %v232_v4 }
 0x142   :  { %235 = vst [vmem:[#allocation7 + $0x38] sm:$0xff] %v234_v5 }
 0x143   :  { %418 = shalt.err (!%p415_p0)
}
 0x144   :  { %247 = dma.vmem_to_hbm [thread:$0]  %s242_s24, 1024, %s482_s3, [#allocation4], %s434_s15, %s434_s15, %s435_s16  }
 0x145   :  { %431 = dma.done.wait [#allocation4], 1024  }
 0x146   :  { %432 = vsyncadd [#allocation4], 4294966272 }
 0x147   :  { %251 = vsyncpa [#allocation3], 1 }
 0x148   :  { %252 = vsyncpa [#allocation6], 1 }
 0x149   :  { %253 = vsyncpa [#allocation4], 1 }

</bundles_post_ra>
